<compile_context>
chip_gen: v7x
topology: tpu7x:2x2x1
jax: 0.10.0
libtpu: 0.0.40
codegen_flags: <defaults>
</compile_context>

<pallas_src>
import functools

import jax
import jax.numpy as jnp
from jax.experimental import pallas as pl
from jax.experimental.pallas import tpu as pltpu

LANE = 128
SUBLANE = 8


def _round_up(x, m):
    return ((x + m - 1) // m) * m


def _leaky(h, alpha):
    # 2 VPU ops (mul + max) instead of 3 (cmp + mul + select).
    return jnp.maximum(h, alpha * h)


# ----------------------------------------------------------------------------
# Kernels
# ----------------------------------------------------------------------------
def _resident_kernel(*refs, depth, alpha, has_labels):
    """All weights resident in VMEM; whole layer chain fused per batch tile.

    refs (has_labels=True):
        x_ref (tb,Ep), lab_ref (tb,Lp), w0x (Ep,Ep), w0l (Lp,Ep), b0 (1,Ep) f32,
        ws (depth-1,Ep,Ep), bs (depth-1,1,Ep) f32, o_ref (tb,Ep),
        h_ref (tb,Ep) compute_dtype scratch.
    """
    if has_labels:
        (x_ref, lab_ref, w0x_ref, w0l_ref, b0_ref, ws_ref, bs_ref,
         o_ref, h_ref) = refs
    else:
        x_ref, w0x_ref, b0_ref, ws_ref, bs_ref, o_ref, h_ref = refs

    # ---- layer 0 -------------------------------------------------------------
    h = jnp.dot(x_ref[...], w0x_ref[...], preferred_element_type=jnp.float32)
    if has_labels:
        h = h + jnp.dot(lab_ref[...], w0l_ref[...],
                        preferred_element_type=jnp.float32)
    h = h + b0_ref[...]
    h_ref[...] = _leaky(h, alpha).astype(h_ref.dtype)       # fused act + cast

    # ---- layers 1 .. depth-1 (statically unrolled) ----------------------------
    for i in range(depth - 1):
        h = jnp.dot(h_ref[...], ws_ref[i],                   # both compute_dtype
                    preferred_element_type=jnp.float32)
        h = h + bs_ref[i]
        h_ref[...] = _leaky(h, alpha).astype(h_ref.dtype)

    o_ref[...] = h_ref[...].astype(o_ref.dtype)


def _streamed_kernel(*refs, depth, alpha, has_labels):
    """Layer-streamed path: grid = (batch_tiles, depth), layer axis last.

    Only the current (1, Ep, Ep) weight block (double-buffered) plus the small
    layer-0 weights are resident; the activation persists in the VMEM scratch
    across layer steps of the same batch tile.
    """
    if has_labels:
        (x_ref, lab_ref, w0x_ref, w0l_ref, b0_ref, ws_ref, bs_ref,
         o_ref, h_ref) = refs
    else:
        x_ref, w0x_ref, b0_ref, ws_ref, bs_ref, o_ref, h_ref = refs

    l = pl.program_id(1)

    @pl.when(l == 0)
    def _():
        h = jnp.dot(x_ref[...], w0x_ref[...],
                    preferred_element_type=jnp.float32)
        if has_labels:
            h = h + jnp.dot(lab_ref[...], w0l_ref[...],
                            preferred_element_type=jnp.float32)
        h = h + b0_ref[...]
        h_ref[...] = _leaky(h, alpha).astype(h_ref.dtype)

    @pl.when(l > 0)
    def _():
        h = jnp.dot(h_ref[...], ws_ref[0],
                    preferred_element_type=jnp.float32)
        h = h + bs_ref[0]
        h_ref[...] = _leaky(h, alpha).astype(h_ref.dtype)

    @pl.when(l == depth - 1)
    def _():
        o_ref[...] = h_ref[...].astype(o_ref.dtype)


# ----------------------------------------------------------------------------
# Parameter preparation (one-time): pad / split / cast into kernel layout.
# ----------------------------------------------------------------------------
def prepare_params(params, *, emb, label_dim, depth, condition_on_mapper=True,
                   weight_dtype=jnp.float32):
    """Logical params -> kernel layout.

    Logical: w0 (in_dim, emb), b0 (1, emb), ws (depth-1, emb, emb),
             bs (depth-1, 1, emb) -- weights stored as (in, out).
    Kernel : feature dims zero-padded to multiples of 128, w0 split into the
             x-part and (optional) label-part, weights cast to `weight_dtype`,
             biases kept f32.
    """
    ep = _round_up(emb, LANE)
    has_labels = bool(condition_on_mapper) and label_dim > 0
    lp = _round_up(label_dim, LANE) if has_labels else 0
    nw = max(depth - 1, 1)

    w0 = params["w0"]
    if condition_on_mapper:
        w0x_l, w0l_l = w0[:emb], w0[emb:]
    else:
        w0x_l, w0l_l = w0, None

    w0x = jnp.zeros((ep, ep), weight_dtype)
    w0x = w0x.at[:emb, :emb].set(w0x_l.astype(weight_dtype))
    if has_labels:
        w0l = jnp.zeros((lp, ep), weight_dtype)
        w0l = w0l.at[:label_dim, :emb].set(w0l_l.astype(weight_dtype))
    else:
        w0l = None
    b0 = jnp.zeros((1, ep), jnp.float32)
    b0 = b0.at[:, :emb].set(params["b0"].astype(jnp.float32))

    ws = jnp.zeros((nw, ep, ep), weight_dtype)
    bs = jnp.zeros((nw, 1, ep), jnp.float32)
    if depth > 1:
        ws = ws.at[:, :emb, :emb].set(params["ws"].astype(weight_dtype))
        bs = bs.at[:, :, :emb].set(params["bs"].astype(jnp.float32))

    return {"w0x": w0x, "w0l": w0l, "b0": b0, "ws": ws, "bs": bs,
            "emb": emb, "label_dim": label_dim, "depth": depth,
            "has_labels": has_labels,
            "condition_on_mapper": condition_on_mapper}


# ----------------------------------------------------------------------------
# Wrapper
# ----------------------------------------------------------------------------
def _chip_info():
    """Generation-aware VMEM budget and batch-tile default (outside jit)."""
    vmem_cap = 64 << 20                     # conservative (v7x per-TC)
    try:
        vmem_cap = int(pltpu.get_tpu_info().vmem_capacity_bytes)
    except Exception:
        pass
    kind = ""
    try:
        kind = jax.devices()[0].device_kind.lower()
    except Exception:
        pass
    is_v5e = ("v5 lite" in kind) or ("v5e" in kind) or ("v5lite" in kind)
    # Leave ~1/4 of physical VMEM as headroom: ~48 MiB on 64 MiB (v7x),
    # ~96 MiB on 128 MiB parts (v5e/v6e).
    budget = vmem_cap - max(12 << 20, vmem_cap // 4)
    return {"vmem_budget": budget,
            "default_tile": 128 if is_v5e else 256}


def _pick_batch_tile(batch, requested, default_tile):
    if requested is None:
        requested = default_tile
    tb = max(SUBLANE, min(_round_up(requested, SUBLANE),
                          _round_up(batch, SUBLANE)))
    # Only force a >=2-way grid split when each tile still keeps the MXU busy
    # (>=128 rows per core).  For small batches a single tile avoids
    # duplicating the weight DMA across cores and per-step overhead.
    if batch >= 256 and _round_up(batch, tb) // tb < 2:
        tb = max(128, _round_up((batch + 1) // 2, SUBLANE))
    return tb


def style_vectorizer(x, labels, kparams, *, alpha=0.2, batch_tile=None,
                     compute_dtype=None, force_stream=None):
    """Pallas-backed StyleVectorizer forward.

    x:       (B, emb)
    labels:  (B, label_dim) or None when labels are unused
    kparams: output of prepare_params()
    """
    depth = kparams["depth"]
    emb = kparams["emb"]
    has_labels = kparams["has_labels"]
    w0x = kparams["w0x"]
    ep = w0x.shape[0]
    lp = kparams["w0l"].shape[0] if has_labels else 0
    nw = kparams["ws"].shape[0]
    w_dtype = w0x.dtype
    if compute_dtype is None:
        compute_dtype = w_dtype
    out_dtype = x.dtype

    B = x.shape[0]
    chip = _chip_info()
    tb = _pick_batch_tile(B, batch_tile, chip["default_tile"])
    bp = _round_up(B, tb)
    num_tiles = bp // tb

    # Inputs: cast/pad only when actually needed (skips an extra HBM pass when
    # dtype and shape already match the kernel layout).
    xc = x if x.dtype == compute_dtype else x.astype(compute_dtype)
    x_k = xc if (bp == B and ep == emb) else jnp.pad(
        xc, ((0, bp - B), (0, ep - emb)))
    if has_labels:
        lab = labels if labels.dtype == compute_dtype else labels.astype(
            compute_dtype)
        ld = lab.shape[1]
        lab_k = lab if (bp == B and lp == ld) else jnp.pad(
            lab, ((0, bp - B), (0, lp - ld)))

    # ---- VMEM budgeting & path selection -------------------------------------
    w_bytes = jnp.dtype(w_dtype).itemsize
    c_bytes = jnp.dtype(compute_dtype).itemsize
    o_bytes = jnp.dtype(out_dtype).itemsize
    # Activation tiles (double-buffered) + compute_dtype scratch.
    tile_b = (2 * tb * ep * c_bytes
              + (2 * tb * lp * c_bytes if has_labels else 0)
              + 2 * tb * ep * o_bytes
              + tb * ep * c_bytes)
    lw_b = (lp * ep * w_bytes) if has_labels else 0
    # Weights counted x2 for Pallas's default double-buffering.
    resident_w_b = 2 * ((ep * ep + nw * ep * ep) * w_bytes + lw_b
                        + (1 + nw) * ep * 4)
    streamed_w_b = 2 * (ep * ep * w_bytes + lw_b + ep * 4) \
        + 2 * (ep * ep * w_bytes + ep * 4)

    budget = chip["vmem_budget"]
    margin = 2 << 20
    if force_stream is None:
        use_stream = (resident_w_b + tile_b + margin) > budget
    else:
        use_stream = bool(force_stream)

    need = (streamed_w_b if use_stream else resident_w_b) + tile_b + margin
    vmem_limit = int(min(max(need, 24 << 20), budget))
    # TODO(synk): if even the streamed estimate exceeds the budget, shrink tb.

    # ---- build specs ----------------------------------------------------------
    if not use_stream:
        kernel = functools.partial(_resident_kernel, depth=depth, alpha=alpha,
                                   has_labels=has_labels)
        if has_labels:
            in_specs = [
                pl.BlockSpec((tb, ep), lambda i: (i, 0)),          # x tile
                pl.BlockSpec((tb, lp), lambda i: (i, 0)),          # label tile
                pl.BlockSpec((ep, ep), lambda i: (0, 0)),          # w0x
                pl.BlockSpec((lp, ep), lambda i: (0, 0)),          # w0l
                pl.BlockSpec((1, ep), lambda i: (0, 0)),           # b0
                pl.BlockSpec((nw, ep, ep), lambda i: (0, 0, 0)),   # ws
                pl.BlockSpec((nw, 1, ep), lambda i: (0, 0, 0)),    # bs
            ]
            args = (x_k, lab_k, kparams["w0x"], kparams["w0l"], kparams["b0"],
                    kparams["ws"], kparams["bs"])
        else:
            in_specs = [
                pl.BlockSpec((tb, ep), lambda i: (i, 0)),
                pl.BlockSpec((ep, ep), lambda i: (0, 0)),
                pl.BlockSpec((1, ep), lambda i: (0, 0)),
                pl.BlockSpec((nw, ep, ep), lambda i: (0, 0, 0)),
                pl.BlockSpec((nw, 1, ep), lambda i: (0, 0, 0)),
            ]
            args = (x_k, kparams["w0x"], kparams["b0"],
                    kparams["ws"], kparams["bs"])
        grid = (num_tiles,)
        out_spec = pl.BlockSpec((tb, ep), lambda i: (i, 0))
        dim_sem = ("parallel",)
    else:
        kernel = functools.partial(_streamed_kernel, depth=depth, alpha=alpha,
                                   has_labels=has_labels)

        def ws_map(i, l):
            # Layer l uses ws block l-1; at l==0 the (unused) block 0 is
            # prefetched, which is harmless.
            return (jnp.maximum(l - 1, 0), 0, 0)

        if has_labels:
            in_specs = [
                pl.BlockSpec((tb, ep), lambda i, l: (i, 0)),
                pl.BlockSpec((tb, lp), lambda i, l: (i, 0)),
                pl.BlockSpec((ep, ep), lambda i, l: (0, 0)),
                pl.BlockSpec((lp, ep), lambda i, l: (0, 0)),
                pl.BlockSpec((1, ep), lambda i, l: (0, 0)),
                pl.BlockSpec((1, ep, ep), ws_map),
                pl.BlockSpec((1, 1, ep), ws_map),
            ]
            args = (x_k, lab_k, kparams["w0x"], kparams["w0l"], kparams["b0"],
                    kparams["ws"], kparams["bs"])
        else:
            in_specs = [
                pl.BlockSpec((tb, ep), lambda i, l: (i, 0)),
                pl.BlockSpec((ep, ep), lambda i, l: (0, 0)),
                pl.BlockSpec((1, ep), lambda i, l: (0, 0)),
                pl.BlockSpec((1, ep, ep), ws_map),
                pl.BlockSpec((1, 1, ep), ws_map),
            ]
            args = (x_k, kparams["w0x"], kparams["b0"],
                    kparams["ws"], kparams["bs"])
        grid = (num_tiles, depth)
        out_spec = pl.BlockSpec((tb, ep), lambda i, l: (i, 0))
        dim_sem = ("parallel", "arbitrary")

    grid_spec = pltpu.PrefetchScalarGridSpec(
        num_scalar_prefetch=0,
        grid=grid,
        in_specs=in_specs,
        out_specs=out_spec,
        scratch_shapes=[pltpu.VMEM((tb, ep), compute_dtype)],
    )
    out = pl.pallas_call(
        kernel,
        out_shape=jax.ShapeDtypeStruct((bp, ep), out_dtype),
        grid_spec=grid_spec,
        compiler_params=pltpu.CompilerParams(
            dimension_semantics=dim_sem,
            vmem_limit_bytes=vmem_limit),
    )(*args)

    return out[:B, :emb]


# ----------------------------------------------------------------------------
# Reference & synthetic params
# ----------------------------------------------------------------------------
def init_params(key, emb, label_dim, depth, condition_on_mapper=True):
    """Deterministic synthetic parameters (weights stored as (in, out))."""
    in_dim = emb + label_dim if condition_on_mapper else emb
    k0, k1, k2, k3 = jax.random.split(key, 4)
    w0 = jax.random.normal(k0, (in_dim, emb), jnp.float32) / jnp.sqrt(in_dim)
    b0 = 0.01 * jax.random.normal(k1, (1, emb), jnp.float32)
    ws = jax.random.normal(k2, (depth - 1, emb, emb), jnp.float32) / jnp.sqrt(emb)
    bs = 0.01 * jax.random.normal(k3, (depth - 1, 1, emb), jnp.float32)
    return {"w0": w0, "b0": b0, "ws": ws, "bs": bs}


def reference_forward(x, labels, params, *, depth, condition_on_mapper=True,
                      alpha=0.2):
    h = jnp.concatenate((x, labels), axis=1) if condition_on_mapper else x
    h = h @ params["w0"] + params["b0"]
    h = jnp.where(h > 0, h, alpha * h)
    for i in range(depth - 1):
        h = h @ params["ws"][i] + params["bs"][i]
        h = jnp.where(h > 0, h, alpha * h)
    return h


if __name__ == "__main__":
    emb, label_dim, depth = 32, 8, 4

    key = jax.random.PRNGKey(0)
    kx, kl, kp = jax.random.split(key, 3)
    params = init_params(kp, emb, label_dim, depth)

    # --- f32 path (all-resident weights) --------------------------------------
    batch = 8
    x = jax.random.normal(kx, (batch, emb), jnp.float32)
    labels = jax.random.normal(kl, (batch, label_dim), jnp.float32)

    kparams_f32 = prepare_params(params, emb=emb, label_dim=label_dim,
                                 depth=depth)
    out = jax.block_until_ready(style_vectorizer(x, labels, kparams_f32))
    ref = reference_forward(x, labels, params, depth=depth)
    assert out.shape == (batch, emb)
    assert jnp.allclose(out, ref, atol=1e-4, rtol=1e-4), "f32 mismatch"

    # --- layer-streamed path (forced, same small shapes) ------------------------
    out_s = jax.block_until_ready(
        style_vectorizer(x, labels, kparams_f32, force_stream=True))
    assert out_s.shape == (batch, emb)
    assert jnp.allclose(out_s, ref, atol=1e-4, rtol=1e-4), "streamed mismatch"

    # --- batch not divisible by the tile (pad + slice path) ---------------------
    batch2 = 20
    x2 = jax.random.normal(jax.random.PRNGKey(1), (batch2, emb), jnp.float32)
    l2 = jax.random.normal(jax.random.PRNGKey(2), (batch2, label_dim),
                           jnp.float32)
    out2 = jax.block_until_ready(style_vectorizer(x2, l2, kparams_f32))
    ref2 = reference_forward(x2, l2, params, depth=depth)
    assert out2.shape == (batch2, emb)
    assert jnp.allclose(out2, ref2, atol=1e-4, rtol=1e-4), "padded-batch mismatch"

    # --- bf16 weights + bf16-carried activations, f32 accumulation --------------
    kparams_bf16 = prepare_params(params, emb=emb, label_dim=label_dim,
                                  depth=depth, weight_dtype=jnp.bfloat16)
    out_bf16 = jax.block_until_ready(
        style_vectorizer(x, labels, kparams_bf16, compute_dtype=jnp.bfloat16))
    assert out_bf16.shape == (batch, emb)
    assert jnp.allclose(out_bf16.astype(jnp.float32), ref,
                        atol=1e-1, rtol=1e-1), "bf16 mismatch vs f32 reference"

    # --- no-label path (condition_on_mapper=False) ------------------------------
    params_nc = init_params(jax.random.PRNGKey(3), emb, label_dim, depth,
                            condition_on_mapper=False)
    kparams_nc = prepare_params(params_nc, emb=emb, label_dim=label_dim,
                                depth=depth, condition_on_mapper=False)
    out_nc = jax.block_until_ready(style_vectorizer(x, None, kparams_nc))
    ref_nc = reference_forward(x, labels, params_nc, depth=depth,
                               condition_on_mapper=False)
    assert out_nc.shape == (batch, emb)
    assert jnp.allclose(out_nc, ref_nc, atol=1e-4, rtol=1e-4), "no-label mismatch"

    print("KERNEL_OK")
</pallas_src>

<mosaic_0001>
module attributes {stable_mosaic.version = 11 : i64} {
  func.func @_resident_kernel(%arg0: i32, %arg1: memref<8x128xf32, #tpu.memory_space<vmem>>, %arg2: memref<8x128xf32, #tpu.memory_space<vmem>>, %arg3: memref<128x128xf32, #tpu.memory_space<vmem>>, %arg4: memref<128x128xf32, #tpu.memory_space<vmem>>, %arg5: memref<1x128xf32, #tpu.memory_space<vmem>>, %arg6: memref<3x128x128xf32, #tpu.memory_space<vmem>>, %arg7: memref<3x1x128xf32, #tpu.memory_space<vmem>>, %arg8: memref<8x128xf32, #tpu.memory_space<vmem>>, %arg9: memref<8x128xf32, #tpu.memory_space<vmem>>) attributes {dimension_semantics = [#tpu.dimension_semantics<parallel>], iteration_bounds = array<i64: 1>, scalar_prefetch = 0 : i64, scratch_operands = 1 : i64, tpu.core_type = #tpu.core_type<tc>, window_params = [{transform_indices = @transform_0, window_bounds = array<i64: 8, 128>}, {transform_indices = @transform_1, window_bounds = array<i64: 8, 128>}, {pipeline_mode = #tpu.pipeline_mode<synchronous>, transform_indices = @transform_2, window_bounds = array<i64: 128, 128>}, {pipeline_mode = #tpu.pipeline_mode<synchronous>, transform_indices = @transform_3, window_bounds = array<i64: 128, 128>}, {pipeline_mode = #tpu.pipeline_mode<synchronous>, transform_indices = @transform_4, window_bounds = array<i64: 1, 128>}, {pipeline_mode = #tpu.pipeline_mode<synchronous>, transform_indices = @transform_5, window_bounds = array<i64: 3, 128, 128>}, {pipeline_mode = #tpu.pipeline_mode<synchronous>, transform_indices = @transform_6, window_bounds = array<i64: 3, 1, 128>}, {transform_indices = @transform_7, window_bounds = array<i64: 8, 128>}]} {
    %c0 = arith.constant 0 : index
    %c0_0 = arith.constant 0 : index
    %0 = vector.load %arg1[%c0, %c0_0] : memref<8x128xf32, #tpu.memory_space<vmem>>, vector<8x128xf32>
    %c0_1 = arith.constant 0 : index
    %c0_2 = arith.constant 0 : index
    %1 = vector.load %arg3[%c0_1, %c0_2] : memref<128x128xf32, #tpu.memory_space<vmem>>, vector<128x128xf32>
    %cst = arith.constant dense<0.000000e+00> : vector<8x128xf32>
    %2 = tpu.matmul %0, %1, %cst {dimension_numbers = #tpu.dot_dimension_numbers<[1], [0], [0], [1], [0, 0, 1, 1], [], []>} : vector<8x128xf32>, vector<128x128xf32>, vector<8x128xf32> -> vector<8x128xf32>
    %c0_3 = arith.constant 0 : index
    %c0_4 = arith.constant 0 : index
    %3 = vector.load %arg2[%c0_3, %c0_4] : memref<8x128xf32, #tpu.memory_space<vmem>>, vector<8x128xf32>
    %c0_5 = arith.constant 0 : index
    %c0_6 = arith.constant 0 : index
    %4 = vector.load %arg4[%c0_5, %c0_6] : memref<128x128xf32, #tpu.memory_space<vmem>>, vector<128x128xf32>
    %cst_7 = arith.constant dense<0.000000e+00> : vector<8x128xf32>
    %5 = tpu.matmul %3, %4, %cst_7 {dimension_numbers = #tpu.dot_dimension_numbers<[1], [0], [0], [1], [0, 0, 1, 1], [], []>} : vector<8x128xf32>, vector<128x128xf32>, vector<8x128xf32> -> vector<8x128xf32>
    %6 = arith.addf %2, %5 : vector<8x128xf32>
    %c0_8 = arith.constant 0 : index
    %c0_9 = arith.constant 0 : index
    %7 = vector.load %arg5[%c0_8, %c0_9] : memref<1x128xf32, #tpu.memory_space<vmem>>, vector<1x128xf32>
    %8 = vector.broadcast %7 : vector<1x128xf32> to vector<8x128xf32>
    %9 = arith.addf %6, %8 : vector<8x128xf32>
    %cst_10 = arith.constant 2.000000e-01 : f32
    %10 = vector.broadcast %cst_10 : f32 to vector<8x128xf32>
    %11 = arith.mulf %10, %9 : vector<8x128xf32>
    %12 = arith.maximumf %9, %11 : vector<8x128xf32>
    %c0_11 = arith.constant 0 : index
    %c0_12 = arith.constant 0 : index
    %13 = vector.load %arg9[%c0_11, %c0_12] : memref<8x128xf32, #tpu.memory_space<vmem>>, vector<8x128xf32>
    tpu.vector_store %arg9[%c0_11, %c0_12], %12 {strides = array<i32>} : memref<8x128xf32, #tpu.memory_space<vmem>>, vector<8x128xf32>,
    %c0_13 = arith.constant 0 : index
    %c0_14 = arith.constant 0 : index
    %14 = vector.load %arg9[%c0_13, %c0_14] : memref<8x128xf32, #tpu.memory_space<vmem>>, vector<8x128xf32>
    %c0_15 = arith.constant 0 : index
    %c0_16 = arith.constant 0 : index
    %c0_17 = arith.constant 0 : index
    %15 = vector.load %arg6[%c0_15, %c0_16, %c0_17] : memref<3x128x128xf32, #tpu.memory_space<vmem>>, vector<1x128x128xf32>
    %16 = vector.shape_cast %15 : vector<1x128x128xf32> to vector<128x128xf32>
    %cst_18 = arith.constant dense<0.000000e+00> : vector<8x128xf32>
    %17 = tpu.matmul %14, %16, %cst_18 {dimension_numbers = #tpu.dot_dimension_numbers<[1], [0], [0], [1], [0, 0, 1, 1], [], []>} : vector<8x128xf32>, vector<128x128xf32>, vector<8x128xf32> -> vector<8x128xf32>
    %c0_19 = arith.constant 0 : index
    %c0_20 = arith.constant 0 : index
    %c0_21 = arith.constant 0 : index
    %18 = vector.load %arg7[%c0_19, %c0_20, %c0_21] : memref<3x1x128xf32, #tpu.memory_space<vmem>>, vector<1x1x128xf32>
    %19 = vector.shape_cast %18 : vector<1x1x128xf32> to vector<1x128xf32>
    %20 = vector.broadcast %19 : vector<1x128xf32> to vector<8x128xf32>
    %21 = arith.addf %17, %20 : vector<8x128xf32>
    %cst_22 = arith.constant 2.000000e-01 : f32
    %22 = vector.broadcast %cst_22 : f32 to vector<8x128xf32>
    %23 = arith.mulf %22, %21 : vector<8x128xf32>
    %24 = arith.maximumf %21, %23 : vector<8x128xf32>
    %c0_23 = arith.constant 0 : index
    %c0_24 = arith.constant 0 : index
    %25 = vector.load %arg9[%c0_23, %c0_24] : memref<8x128xf32, #tpu.memory_space<vmem>>, vector<8x128xf32>
    tpu.vector_store %arg9[%c0_23, %c0_24], %24 {strides = array<i32>} : memref<8x128xf32, #tpu.memory_space<vmem>>, vector<8x128xf32>,
    %c0_25 = arith.constant 0 : index
    %c0_26 = arith.constant 0 : index
    %26 = vector.load %arg9[%c0_25, %c0_26] : memref<8x128xf32, #tpu.memory_space<vmem>>, vector<8x128xf32>
    %c1 = arith.constant 1 : index
    %c0_27 = arith.constant 0 : index
    %c0_28 = arith.constant 0 : index
    %27 = vector.load %arg6[%c1, %c0_27, %c0_28] : memref<3x128x128xf32, #tpu.memory_space<vmem>>, vector<1x128x128xf32>
    %28 = vector.shape_cast %27 : vector<1x128x128xf32> to vector<128x128xf32>
    %cst_29 = arith.constant dense<0.000000e+00> : vector<8x128xf32>
    %29 = tpu.matmul %26, %28, %cst_29 {dimension_numbers = #tpu.dot_dimension_numbers<[1], [0], [0], [1], [0, 0, 1, 1], [], []>} : vector<8x128xf32>, vector<128x128xf32>, vector<8x128xf32> -> vector<8x128xf32>
    %c1_30 = arith.constant 1 : index
    %c0_31 = arith.constant 0 : index
    %c0_32 = arith.constant 0 : index
    %30 = vector.load %arg7[%c1_30, %c0_31, %c0_32] : memref<3x1x128xf32, #tpu.memory_space<vmem>>, vector<1x1x128xf32>
    %31 = vector.shape_cast %30 : vector<1x1x128xf32> to vector<1x128xf32>
    %32 = vector.broadcast %31 : vector<1x128xf32> to vector<8x128xf32>
    %33 = arith.addf %29, %32 : vector<8x128xf32>
    %cst_33 = arith.constant 2.000000e-01 : f32
    %34 = vector.broadcast %cst_33 : f32 to vector<8x128xf32>
    %35 = arith.mulf %34, %33 : vector<8x128xf32>
    %36 = arith.maximumf %33, %35 : vector<8x128xf32>
    %c0_34 = arith.constant 0 : index
    %c0_35 = arith.constant 0 : index
    %37 = vector.load %arg9[%c0_34, %c0_35] : memref<8x128xf32, #tpu.memory_space<vmem>>, vector<8x128xf32>
    tpu.vector_store %arg9[%c0_34, %c0_35], %36 {strides = array<i32>} : memref<8x128xf32, #tpu.memory_space<vmem>>, vector<8x128xf32>,
    %c0_36 = arith.constant 0 : index
    %c0_37 = arith.constant 0 : index
    %38 = vector.load %arg9[%c0_36, %c0_37] : memref<8x128xf32, #tpu.memory_space<vmem>>, vector<8x128xf32>
    %c2 = arith.constant 2 : index
    %c0_38 = arith.constant 0 : index
    %c0_39 = arith.constant 0 : index
    %39 = vector.load %arg6[%c2, %c0_38, %c0_39] : memref<3x128x128xf32, #tpu.memory_space<vmem>>, vector<1x128x128xf32>
    %40 = vector.shape_cast %39 : vector<1x128x128xf32> to vector<128x128xf32>
    %cst_40 = arith.constant dense<0.000000e+00> : vector<8x128xf32>
    %41 = tpu.matmul %38, %40, %cst_40 {dimension_numbers = #tpu.dot_dimension_numbers<[1], [0], [0], [1], [0, 0, 1, 1], [], []>} : vector<8x128xf32>, vector<128x128xf32>, vector<8x128xf32> -> vector<8x128xf32>
    %c2_41 = arith.constant 2 : index
    %c0_42 = arith.constant 0 : index
    %c0_43 = arith.constant 0 : index
    %42 = vector.load %arg7[%c2_41, %c0_42, %c0_43] : memref<3x1x128xf32, #tpu.memory_space<vmem>>, vector<1x1x128xf32>
    %43 = vector.shape_cast %42 : vector<1x1x128xf32> to vector<1x128xf32>
    %44 = vector.broadcast %43 : vector<1x128xf32> to vector<8x128xf32>
    %45 = arith.addf %41, %44 : vector<8x128xf32>
    %cst_44 = arith.constant 2.000000e-01 : f32
    %46 = vector.broadcast %cst_44 : f32 to vector<8x128xf32>
    %47 = arith.mulf %46, %45 : vector<8x128xf32>
    %48 = arith.maximumf %45, %47 : vector<8x128xf32>
    %c0_45 = arith.constant 0 : index
    %c0_46 = arith.constant 0 : index
    %49 = vector.load %arg9[%c0_45, %c0_46] : memref<8x128xf32, #tpu.memory_space<vmem>>, vector<8x128xf32>
    tpu.vector_store %arg9[%c0_45, %c0_46], %48 {strides = array<i32>} : memref<8x128xf32, #tpu.memory_space<vmem>>, vector<8x128xf32>,
    %c0_47 = arith.constant 0 : index
    %c0_48 = arith.constant 0 : index
    %50 = vector.load %arg9[%c0_47, %c0_48] : memref<8x128xf32, #tpu.memory_space<vmem>>, vector<8x128xf32>
    %c0_49 = arith.constant 0 : index
    %c0_50 = arith.constant 0 : index
    %51 = vector.load %arg8[%c0_49, %c0_50] : memref<8x128xf32, #tpu.memory_space<vmem>>, vector<8x128xf32>
    tpu.vector_store %arg8[%c0_49, %c0_50], %50 {strides = array<i32>} : memref<8x128xf32, #tpu.memory_space<vmem>>, vector<8x128xf32>,
    return
  }
  func.func @transform_0(%arg0: i32) -> (i32, i32) {
    %c0_i32 = arith.constant 0 : i32
    %c0_i32_0 = arith.constant 0 : i32
    return %arg0, %c0_i32 : i32, i32
  }
  func.func @transform_1(%arg0: i32) -> (i32, i32) {
    %c0_i32 = arith.constant 0 : i32
    %c0_i32_0 = arith.constant 0 : i32
    return %arg0, %c0_i32 : i32, i32
  }
  func.func @transform_2(%arg0: i32) -> (i32, i32) {
    %c0_i32 = arith.constant 0 : i32
    %c0_i32_0 = arith.constant 0 : i32
    %c0_i32_1 = arith.constant 0 : i32
    return %c0_i32, %c0_i32_0 : i32, i32
  }
  func.func @transform_3(%arg0: i32) -> (i32, i32) {
    %c0_i32 = arith.constant 0 : i32
    %c0_i32_0 = arith.constant 0 : i32
    %c0_i32_1 = arith.constant 0 : i32
    return %c0_i32, %c0_i32_0 : i32, i32
  }
  func.func @transform_4(%arg0: i32) -> (i32, i32) {
    %c0_i32 = arith.constant 0 : i32
    %c0_i32_0 = arith.constant 0 : i32
    %c0_i32_1 = arith.constant 0 : i32
    return %c0_i32, %c0_i32_0 : i32, i32
  }
  func.func @transform_5(%arg0: i32) -> (i32, i32, i32) {
    %c0_i32 = arith.constant 0 : i32
    %c0_i32_0 = arith.constant 0 : i32
    %c0_i32_1 = arith.constant 0 : i32
    %c0_i32_2 = arith.constant 0 : i32
    return %c0_i32, %c0_i32_0, %c0_i32_1 : i32, i32, i32
  }
  func.func @transform_6(%arg0: i32) -> (i32, i32, i32) {
    %c0_i32 = arith.constant 0 : i32
    %c0_i32_0 = arith.constant 0 : i32
    %c0_i32_1 = arith.constant 0 : i32
    %c0_i32_2 = arith.constant 0 : i32
    return %c0_i32, %c0_i32_0, %c0_i32_1 : i32, i32, i32
  }
  func.func @transform_7(%arg0: i32) -> (i32, i32) {
    %c0_i32 = arith.constant 0 : i32
    %c0_i32_0 = arith.constant 0 : i32
    return %arg0, %c0_i32 : i32, i32
  }
}

</mosaic_0001>

<bundles_post_ra>
// kernel: tpu_custom_call.1
= control target key start
LH: loop header
LB: loop body
LE: loop exit
PB: predicated region body
PF: predicated region fallthrough
CT: control target
= control target key end

     0   :  { %12 = vsyncpa [#allocation4], 0  ;;  %s1321_s0 = inlined_call_operand.hbm [shape: f32[8,128], index: 0, kind: input, shape index: {}]   ;;  %s1322_s1 = inlined_call_operand.hbm [shape: f32[8,128], index: 1, kind: input, shape index: {}]   ;;  %s1323_s2 = inlined_call_operand.hbm [shape: f32[128,128], index: 2, kind: input, shape index: {}]   ;;  %s1324_s3 = inlined_call_operand.hbm [shape: f32[128,128], index: 3, kind: input, shape index: {}]   ;;  %s1325_s4 = inlined_call_operand.vmem [shape: f32[1,128], index: 4, kind: input, shape index: {}]   ;;  %s1326_s5 = inlined_call_operand.hbm [shape: f32[3,128,128], index: 5, kind: input, shape index: {}]   ;;  %s1327_s6 = inlined_call_operand.vmem [shape: f32[3,1,128], index: 6, kind: input, shape index: {}]   ;;  %s1328_s7 = inlined_call_operand.hbm [shape: f32[8,128], index: 7, kind: output, shape index: {}]  }
   0x1   :  { %13 = vsyncpa [#allocation7], 0 }
   0x2   :  { %14 = vsyncpa [#allocation10], 0 }
   0x3   :  { %15 = vsyncpa [#allocation5], 0  ;;  %s1127_s24 = smov [#allocation6]   ;;  %s987_s28 = scalar_lea.hbm %s1322_s1, 128 }
   0x4   :  { %s32_s25 = sshll.u32 %s1127_s24, 4  ;;  %p988_p0 = scmp.ne.s32.totalorder %s1322_s1, %s987_s28  ;;  %s33_s25 = int_to_ptr.vmem [resolvable:$true] %s32_s25 }
   0x5   :  { %p991_p1 = scmp.lt.u32.totalorder %s987_s28, %s1322_s1 }
   0x7   :  { %p993_p2 = pnand %p991_p1, %p988_p0 }
   0x9   :  { %996 = shalt.err (!%p993_p2)
}
   0xa   :  { %s997_s10 = scalar_lea.vmem %s33_s25, 128  ;;  %p1002_p4 = scmp.lt.s32.totalorder %s33_s25, %s33_s25 }
   0xb   :  { %p998_p3 = scmp.ne.s32.totalorder %s33_s25, %s997_s10  ;;  %p1003_p5 = scmp.lt.s32.totalorder %s997_s10, %s997_s10 }
   0xd   :  { %p1004_p6 = por %p1003_p5, %p1002_p4 }
   0xf   :  { %p1005_p7 = pnand %p1004_p6, %p998_p3 }
  0x11   :  { %1008 = shalt.err (!%p1005_p7)
}
  0x12   :  { %35 = dma.hbm_to_vmem [thread:$0]  %s1322_s1, 128, %s33_s25, [#allocation7]  }
  0x13   :  { %s1128_s13 = smov [#allocation9]   ;;  %s1129_s15 = smov [#allocation3]  }
  0x14   :  { %s53_s14 = sshll.u32 %s1128_s13, 4  ;;  %s22_s16 = sshll.u32 %s1129_s15, 4  ;;  %s54_s14 = int_to_ptr.vmem [resolvable:$true] %s53_s14  ;;  %s23_s16 = int_to_ptr.vmem [resolvable:$true] %s22_s16 }
  0x15   :  { %s1009_s19 = scalar_lea.hbm %s1324_s3, 2048 }
  0x16   :  { %p1010_p8 = scmp.ne.s32.totalorder %s1324_s3, %s1009_s19  ;;  %p1013_p9 = scmp.lt.u32.totalorder %s1009_s19, %s1324_s3 }
  0x18   :  { %p1015_p10 = pnand %p1013_p9, %p1010_p8 }
  0x1a   :  { %1018 = shalt.err (!%p1015_p10)
}
  0x1b   :  { %s1019_s1 = scalar_lea.vmem %s54_s14, 2048  ;;  %p1024_p12 = scmp.lt.s32.totalorder %s54_s14, %s54_s14 }
  0x1c   :  { %p1020_p11 = scmp.ne.s32.totalorder %s54_s14, %s1019_s1  ;;  %p1025_p13 = scmp.lt.s32.totalorder %s1019_s1, %s1019_s1 }
  0x1e   :  { %p1026_p0 = por %p1025_p13, %p1024_p12 }
  0x20   :  { %p1027_p1 = pnand %p1026_p0, %p1020_p11 }
  0x22   :  { %1030 = shalt.err (!%p1027_p1)
}
  0x23   :  { %s1130_s24 = smov 128   ;;  %s1131_s25 = smov 8  }
  0x24   :  { %59 = dma.hbm_to_vmem [thread:$0]  %s1324_s3, 2048, %s54_s14, [#allocation10], %s1130_s24, %s1130_s24, %s1131_s25  }
  0x25   :  { %s1031_s30 = scalar_lea.hbm %s1321_s0, 128 }
  0x26   :  { %p1032_p2 = scmp.ne.s32.totalorder %s1321_s0, %s1031_s30  ;;  %p1035_p3 = scmp.lt.u32.totalorder %s1031_s30, %s1321_s0 }
  0x28   :  { %p1037_p4 = pnand %p1035_p3, %p1032_p2 }
  0x2a   :  { %1040 = shalt.err (!%p1037_p4)
}
  0x2b   :  { %s1041_s12 = scalar_lea.vmem %s23_s16, 128  ;;  %p1046_p6 = scmp.lt.s32.totalorder %s23_s16, %s23_s16 }
  0x2c   :  { %p1042_p5 = scmp.ne.s32.totalorder %s23_s16, %s1041_s12  ;;  %p1047_p7 = scmp.lt.s32.totalorder %s1041_s12, %s1041_s12 }
  0x2e   :  { %p1048_p8 = por %p1047_p7, %p1046_p6 }
  0x30   :  { %p1049_p9 = pnand %p1048_p8, %p1042_p5 }
  0x32   :  { %1052 = shalt.err (!%p1049_p9)
}
  0x33   :  { %25 = dma.hbm_to_vmem [thread:$0]  %s1321_s0, 128, %s23_s16, [#allocation4]  }
  0x34   :  { %s1132_s14 = smov [#allocation8]   ;;  %s1133_s17 = smov [#allocation11]  }
  0x35   :  { %s41_s15 = sshll.u32 %s1132_s14, 4  ;;  %s67_s18 = sshll.u32 %s1133_s17, 4  ;;  %s42_s15 = int_to_ptr.vmem [resolvable:$true] %s41_s15  ;;  %s68_s18 = int_to_ptr.vmem [resolvable:$true] %s67_s18 }
  0x36   :  { %s1053_s21 = scalar_lea.hbm %s1323_s2, 2048 }
  0x37   :  { %p1054_p10 = scmp.ne.s32.totalorder %s1323_s2, %s1053_s21  ;;  %p1057_p11 = scmp.lt.u32.totalorder %s1053_s21, %s1323_s2 }
  0x39   :  { %p1059_p12 = pnand %p1057_p11, %p1054_p10 }
  0x3b   :  { %1062 = shalt.err (!%p1059_p12)
}
  0x3c   :  { %s1063_s0 = scalar_lea.vmem %s42_s15, 2048  ;;  %p1068_p0 = scmp.lt.s32.totalorder %s42_s15, %s42_s15 }
  0x3d   :  { %p1064_p13 = scmp.ne.s32.totalorder %s42_s15, %s1063_s0  ;;  %p1069_p1 = scmp.lt.s32.totalorder %s1063_s0, %s1063_s0 }
  0x3f   :  { %p1070_p2 = por %p1069_p1, %p1068_p0 }
  0x41   :  { %p1071_p3 = pnand %p1070_p2, %p1064_p13 }
  0x43   :  { %1074 = shalt.err (!%p1071_p3)
}
  0x44   :  { %47 = dma.hbm_to_vmem [thread:$0]  %s1323_s2, 2048, %s42_s15, [#allocation7], %s1130_s24, %s1130_s24, %s1131_s25  }
  0x45   :  { %s1075_s30 = scalar_lea.hbm %s1326_s5, 6144 }
  0x46   :  { %p1076_p4 = scmp.ne.s32.totalorder %s1326_s5, %s1075_s30  ;;  %p1079_p5 = scmp.lt.u32.totalorder %s1075_s30, %s1326_s5 }
  0x48   :  { %p1081_p6 = pnand %p1079_p5, %p1076_p4 }
  0x4a   :  { %1084 = shalt.err (!%p1081_p6)
}
  0x4b   :  { %s1085_s12 = scalar_lea.vmem %s68_s18, 6144  ;;  %p1090_p8 = scmp.lt.s32.totalorder %s68_s18, %s68_s18 }
  0x4c   :  { %p1086_p7 = scmp.ne.s32.totalorder %s68_s18, %s1085_s12  ;;  %p1091_p9 = scmp.lt.s32.totalorder %s1085_s12, %s1085_s12 }
  0x4e   :  { %p1092_p10 = por %p1091_p9, %p1090_p8 }
  0x50   :  { %p1093_p11 = pnand %p1092_p10, %p1086_p7 }
  0x52   :  { %1096 = shalt.err (!%p1093_p11)
}
  0x53   :  { %73 = dma.hbm_to_vmem [thread:$0]  %s1326_s5, 6144, %s68_s18, [#allocation10], %s1130_s24, %s1130_s24, %s1131_s25  }
  0x54   :  { %1119 = dma.done.wait [#allocation4], 128  }
  0x55   :  { %1120 = vsyncadd [#allocation4], 4294967168 }
  0x56   :  { %1121 = dma.done.wait [#allocation7], 2176  }
  0x57   :  { %1122 = vsyncadd [#allocation7], 4294965120 }
  0x58   :  { %1123 = dma.done.wait [#allocation10], 8192  }
  0x59   :  { %1124 = vsyncadd [#allocation10], 4294959104  ;;  %v1134_v0 = vmov 0.0|0.0   ;;  %vm1135_vm0 = vmmov 0   ;;  %v1136_v1 = vmov 0.0   ;;  %v109_v2 = vld [vmem:[#allocation9] sm:$0xff] }
  0x5a   :  { %856 = vmatprep.subr.bf16.mxu0 %v1134_v0  ;;  %880 = vmatprep.subr.bf16.mxu1 %v1134_v0  ;;  %v110_v3 = vld [vmem:[#allocation9 + $0x8] sm:$0xff]  ;;  %v92_v4 = vld [vmem:[#allocation8] sm:$0xff]  ;;  %v111_v7 = vld [vmem:[#allocation9 + $0x10] sm:$0xff]  ;;  %s1137_s18 = smov [#allocation12]  }
  0x5b   :  { %713 = vmatprep.mubr.msk.f32.mxu0 %vm1135_vm0, %v1136_v1  ;;  %748 = vmatprep.mubr.msk.f32.mxu1 %vm1135_vm0, %v1136_v1  ;;  %v857_v5 = vpack.c.bf16 %v110_v3, %v109_v2  ;;  %v93_v6 = vld [vmem:[#allocation8 + $0x8] sm:$0xff]  ;;  %v112_v8 = vld [vmem:[#allocation9 + $0x18] sm:$0xff]  ;;  %v94_v10 = vld [vmem:[#allocation8 + $0x10] sm:$0xff]  ;;  %s579_s19 = sshll.u32 %s1137_s18, 4  ;;  %s580_s19 = int_to_ptr.vmem [resolvable:$true] %s579_s19 }
  0x5c   :  { %v881_v9 = vpack.c.bf16 %v93_v6, %v92_v4  ;;  %v95_v11 = vld [vmem:[#allocation8 + $0x18] sm:$0xff]  ;;  %v860_v12 = vpack.c.bf16 %v112_v8, %v111_v7  ;;  %v113_v14 = vld [vmem:[#allocation9 + $0x20] sm:$0xff]  ;;  %v114_v15 = vld [vmem:[#allocation9 + $0x28] sm:$0xff]  ;;  %s1097_s20 = scalar_lea.vmem %s580_s19, 128  ;;  %p1102_p13 = scmp.lt.s32.totalorder %s580_s19, %s580_s19 }
  0x5d   :  { %858 = vmatpush3.bf16.msra.mxu0 %v857_v5  ;;  %v884_v13 = vpack.c.bf16 %v95_v11, %v94_v10  ;;  %v96_v16 = vld [vmem:[#allocation8 + $0x20] sm:$0xff]  ;;  %v97_v17 = vld [vmem:[#allocation8 + $0x28] sm:$0xff]  ;;  %v863_v18 = vpack.c.bf16 %v114_v15, %v113_v14  ;;  %v115_v20 = vld [vmem:[#allocation9 + $0x30] sm:$0xff]  ;;  %p1098_p12 = scmp.ne.s32.totalorder %s580_s19, %s1097_s20  ;;  %p1103_p0 = scmp.lt.s32.totalorder %s1097_s20, %s1097_s20 }
  0x5e   :  { %882 = vmatpush3.bf16.msra.mxu1 %v881_v9  ;;  %859 = vmatprep.subr.bf16.mxu0 %v1134_v0  ;;  %v887_v19 = vpack.c.bf16 %v97_v17, %v96_v16  ;;  %v116_v21 = vld [vmem:[#allocation9 + $0x38] sm:$0xff]  ;;  %v98_v22 = vld [vmem:[#allocation8 + $0x30] sm:$0xff]  ;;  %v117_v26 = vld [vmem:[#allocation9 + $0x40] sm:$0xff] }
  0x5f   :  { %883 = vmatprep.subr.bf16.mxu1 %v1134_v0  ;;  %v99_v23 = vld [vmem:[#allocation8 + $0x38] sm:$0xff]  ;;  %v866_v24 = vpack.c.bf16 %v116_v21, %v115_v20  ;;  %v118_v27 = vld [vmem:[#allocation9 + $0x48] sm:$0xff]  ;;  %v100_v28 = vld [vmem:[#allocation8 + $0x40] sm:$0xff]  ;;  %p1104_p1 = por %p1103_p0, %p1102_p13 }
  0x60   :  { %v890_v25 = vpack.c.bf16 %v99_v23, %v98_v22  ;;  %v101_v29 = vld [vmem:[#allocation8 + $0x48] sm:$0xff]  ;;  %v869_v30 = vpack.c.bf16 %v118_v27, %v117_v26  ;;  %v119_v32 = vld [vmem:[#allocation9 + $0x50] sm:$0xff]  ;;  %v120_v33 = vld [vmem:[#allocation9 + $0x58] sm:$0xff] }
  0x61   :  { %861 = vmatpush3.bf16.msra.mxu0 %v860_v12  ;;  %v893_v31 = vpack.c.bf16 %v101_v29, %v100_v28  ;;  %v102_v34 = vld [vmem:[#allocation8 + $0x50] sm:$0xff]  ;;  %v103_v35 = vld [vmem:[#allocation8 + $0x58] sm:$0xff]  ;;  %v872_v36 = vpack.c.bf16 %v120_v33, %v119_v32  ;;  %v121_v38 = vld [vmem:[#allocation9 + $0x60] sm:$0xff]  ;;  %p1105_p2 = pnand %p1104_p1, %p1098_p12 }
  0x62   :  { %885 = vmatpush3.bf16.msra.mxu1 %v884_v13  ;;  %862 = vmatprep.subr.bf16.mxu0 %v1134_v0  ;;  %v896_v37 = vpack.c.bf16 %v103_v35, %v102_v34  ;;  %v122_v39 = vld [vmem:[#allocation9 + $0x68] sm:$0xff]  ;;  %v104_v40 = vld [vmem:[#allocation8 + $0x60] sm:$0xff]  ;;  %v123_v44 = vld [vmem:[#allocation9 + $0x70] sm:$0xff] }
  0x63   :  { %886 = vmatprep.subr.bf16.mxu1 %v1134_v0  ;;  %v105_v41 = vld [vmem:[#allocation8 + $0x68] sm:$0xff]  ;;  %v875_v42 = vpack.c.bf16 %v122_v39, %v121_v38  ;;  %v124_v45 = vld [vmem:[#allocation9 + $0x78] sm:$0xff]  ;;  %v106_v46 = vld [vmem:[#allocation8 + $0x70] sm:$0xff] }
  0x64   :  { %v899_v43 = vpack.c.bf16 %v105_v41, %v104_v40  ;;  %v107_v47 = vld [vmem:[#allocation8 + $0x78] sm:$0xff]  ;;  %v878_v48 = vpack.c.bf16 %v124_v45, %v123_v44  ;;  %v277_v50 = vld [vmem:[#allocation11] sm:$0xff]  ;;  %v278_v51 = vld [vmem:[#allocation11 + $0x8] sm:$0xff] }
  0x65   :  { %864 = vmatpush3.bf16.msra.mxu0 %v863_v18  ;;  %v902_v49 = vpack.c.bf16 %v107_v47, %v106_v46  ;;  %v108_v52 = vld [vmem:[#allocation6] sm:$0xff]  ;;  %v905_v53 = vpack.c.bf16 %v278_v51, %v277_v50  ;;  %v91_v54 = vld [vmem:[#allocation3] sm:$0xff]  ;;  %v281_v58 = vld [vmem:[#allocation11 + $0x20] sm:$0xff] }
  0x66   :  { %888 = vmatpush3.bf16.msra.mxu1 %v887_v19  ;;  %865 = vmatprep.subr.bf16.mxu0 %v1134_v0  ;;  %v279_v55 = vld [vmem:[#allocation11 + $0x10] sm:$0xff]  ;;  %v280_v56 = vld [vmem:[#allocation11 + $0x18] sm:$0xff]  ;;  %v282_v59 = vld [vmem:[#allocation11 + $0x28] sm:$0xff] }
  0x67   :  { %889 = vmatprep.subr.bf16.mxu1 %v1134_v0  ;;  %v908_v57 = vpack.c.bf16 %v280_v56, %v279_v55  ;;  %v911_v60 = vpack.c.bf16 %v282_v59, %v281_v58  ;;  %v283_v61 = vld [vmem:[#allocation11 + $0x30] sm:$0xff]  ;;  %v284_v62 = vld [vmem:[#allocation11 + $0x38] sm:$0xff]  ;;  %v285_v2 = vld [vmem:[#allocation11 + $0x40] sm:$0xff] }
  0x68   :  { %v914_v63 = vpack.c.bf16 %v284_v62, %v283_v61  ;;  %v286_v3 = vld [vmem:[#allocation11 + $0x48] sm:$0xff]  ;;  %v287_v5 = vld [vmem:[#allocation11 + $0x50] sm:$0xff]  ;;  %v288_v6 = vld [vmem:[#allocation11 + $0x58] sm:$0xff] }
  0x69   :  { %867 = vmatpush3.bf16.msra.mxu0 %v866_v24  ;;  %v917_v4 = vpack.c.bf16 %v286_v3, %v285_v2  ;;  %v920_v7 = vpack.c.bf16 %v288_v6, %v287_v5  ;;  %v289_v8 = vld [vmem:[#allocation11 + $0x60] sm:$0xff]  ;;  %v290_v9 = vld [vmem:[#allocation11 + $0x68] sm:$0xff]  ;;  %v291_v11 = vld [vmem:[#allocation11 + $0x70] sm:$0xff] }
  0x6a   :  { %891 = vmatpush3.bf16.msra.mxu1 %v890_v25  ;;  %868 = vmatprep.subr.bf16.mxu0 %v1134_v0  ;;  %v923_v10 = vpack.c.bf16 %v290_v9, %v289_v8  ;;  %v292_v12 = vld [vmem:[#allocation11 + $0x78] sm:$0xff]  ;;  %v375_v14 = vld [vmem:[#allocation11 + $0x80] sm:$0xff]  ;;  %v376_v15 = vld [vmem:[#allocation11 + $0x88] sm:$0xff] }
  0x6b   :  { %892 = vmatprep.subr.bf16.mxu1 %v1134_v0  ;;  %v926_v13 = vpack.c.bf16 %v292_v12, %v291_v11  ;;  %v377_v16 = vld [vmem:[#allocation11 + $0x90] sm:$0xff]  ;;  %v929_v17 = vpack.c.bf16 %v376_v15, %v375_v14  ;;  %v378_v18 = vld [vmem:[#allocation11 + $0x98] sm:$0xff]  ;;  %v379_v20 = vld [vmem:[#allocation11 + $0xa0] sm:$0xff] }
  0x6c   :  { %v932_v19 = vpack.c.bf16 %v378_v18, %v377_v16  ;;  %v380_v21 = vld [vmem:[#allocation11 + $0xa8] sm:$0xff]  ;;  %v381_v23 = vld [vmem:[#allocation11 + $0xb0] sm:$0xff]  ;;  %v382_v24 = vld [vmem:[#allocation11 + $0xb8] sm:$0xff] }
  0x6d   :  { %870 = vmatpush3.bf16.msra.mxu0 %v869_v30  ;;  %v935_v22 = vpack.c.bf16 %v380_v21, %v379_v20  ;;  %v938_v25 = vpack.c.bf16 %v382_v24, %v381_v23  ;;  %v383_v26 = vld [vmem:[#allocation11 + $0xc0] sm:$0xff]  ;;  %v384_v27 = vld [vmem:[#allocation11 + $0xc8] sm:$0xff]  ;;  %v385_v29 = vld [vmem:[#allocation11 + $0xd0] sm:$0xff] }
  0x6e   :  { %894 = vmatpush3.bf16.msra.mxu1 %v893_v31  ;;  %871 = vmatprep.subr.bf16.mxu0 %v1134_v0  ;;  %v941_v28 = vpack.c.bf16 %v384_v27, %v383_v26  ;;  %v386_v30 = vld [vmem:[#allocation11 + $0xd8] sm:$0xff]  ;;  %v590_v34 = vld [vmem:[%s1325_s4] ss:$0 sm:$0xff]  ;;  %v387_v41 = vld [vmem:[#allocation11 + $0xe0] sm:$0xff] }
  0x6f   :  { %895 = vmatprep.subr.bf16.mxu1 %v1134_v0  ;;  %v944_v31 = vpack.c.bf16 %v386_v30, %v385_v29  ;;  %v389_v44 = vld [vmem:[#allocation11 + $0xf0] sm:$0xff]  ;;  %v390_v45 = vld [vmem:[#allocation11 + $0xf8] sm:$0xff]  ;;  %v474_v47 = vld [vmem:[#allocation11 + $0x100] sm:$0xff] }
  0x70   :  { %v950_v46 = vpack.c.bf16 %v390_v45, %v389_v44  ;;  %v477_v51 = vld [vmem:[#allocation11 + $0x118] sm:$0xff]  ;;  %v480_v55 = vld [vmem:[#allocation11 + $0x130] sm:$0xff]  ;;  %v482_v58 = vld [vmem:[#allocation11 + $0x140] sm:$0xff] }
  0x71   :  { %873 = vmatpush3.bf16.msra.mxu0 %v872_v36  ;;  %v481_v56 = vld [vmem:[#allocation11 + $0x138] sm:$0xff]  ;;  %v483_v59 = vld [vmem:[#allocation11 + $0x148] sm:$0xff]  ;;  %v484_v61 = vld [vmem:[#allocation11 + $0x150] sm:$0xff] }
  0x72   :  { %897 = vmatpush3.bf16.msra.mxu1 %v896_v37  ;;  %874 = vmatprep.subr.bf16.mxu0 %v1134_v0  ;;  %v485_v62 = vld [vmem:[#allocation11 + $0x158] sm:$0xff]  ;;  %v591_v2 = vld [vmem:[%s1327_s6] ss:$0 sm:$0xff]  ;;  %v486_v8 = vld [vmem:[#allocation11 + $0x160] sm:$0xff] }
  0x73   :  { %898 = vmatprep.subr.bf16.mxu1 %v1134_v0  ;;  %v487_v9 = vld [vmem:[#allocation11 + $0x168] sm:$0xff]  ;;  %v488_v11 = vld [vmem:[#allocation11 + $0x170] sm:$0xff]  ;;  %v489_v12 = vld [vmem:[#allocation11 + $0x178] sm:$0xff] }
  0x74   :  { %v593_v14 = vld [vmem:[%s1327_s6 + $0x1] ss:$0 sm:$0xff]  ;;  %v595_v20 = vld [vmem:[%s1327_s6 + $0x2] ss:$0 sm:$0xff] }
  0x75   :  { %876 = vmatpush3.bf16.msra.mxu0 %v875_v42  ;;  %v388_v42 = vld [vmem:[#allocation11 + $0xe8] sm:$0xff] }
  0x76   :  { %900 = vmatpush3.bf16.msra.mxu1 %v899_v43  ;;  %877 = vmatprep.subr.bf16.mxu0 %v1134_v0  ;;  %v947_v43 = vpack.c.bf16 %v388_v42, %v387_v41 }
  0x77   :  { %901 = vmatprep.subr.bf16.mxu1 %v1134_v0 }
  0x79   :  { %879 = vmatpush3.bf16.msra.mxu0 %v878_v48  ;;  %v475_v48 = vld [vmem:[#allocation11 + $0x108] sm:$0xff] }
  0x7a   :  { %903 = vmatpush3.bf16.msra.mxu1 %v902_v49  ;;  %904 = vmatprep.subr.bf16.mxu0 %v1134_v0  ;;  %v476_v49 = vld [vmem:[#allocation11 + $0x110] sm:$0xff]  ;;  %v953_v50 = vpack.c.bf16 %v475_v48, %v474_v47 }
  0x7b   :  { %928 = vmatprep.subr.bf16.mxu1 %v1134_v0 }
  0x7c   :  { %714 = vmatmul.mubr.f32.vlgmr.msra.gmra.mrb[0].mxu0 %v108_v52  ;;  %v956_v52 = vpack.c.bf16 %v477_v51, %v476_v49 }
  0x7d   :  { %749 = vmatmul.mubr.f32.vlgmr.msra.gmra.mrb[0].mxu1 %v91_v54  ;;  %906 = vmatpush3.bf16.msra.mxu0 %v905_v53  ;;  %v479_v53 = vld [vmem:[#allocation11 + $0x128] sm:$0xff] }
  0x7e   :  { %907 = vmatprep.subr.bf16.mxu0 %v1134_v0  ;;  %783 = vmatprep.mubr.msk.f32.mxu0 %vm1135_vm0, %v1136_v1 }
  0x7f   :  { %818 = vmatprep.mubr.msk.f32.mxu1 %vm1135_vm0, %v1136_v1  ;;  %930 = vmatpush3.bf16.msra.mxu1 %v929_v17 }
  0x80   :  { %931 = vmatprep.subr.bf16.mxu1 %v1134_v0 }
  0x81   :  { %909 = vmatpush3.bf16.msra.mxu0 %v908_v57  ;;  %v962_v57 = vpack.c.bf16 %v481_v56, %v480_v55 }
  0x82   :  { %910 = vmatprep.subr.bf16.mxu0 %v1134_v0 }
  0x83   :  { %933 = vmatpush3.bf16.msra.mxu1 %v932_v19 }
  0x84   :  { %934 = vmatprep.subr.bf16.mxu1 %v1134_v0 }
  0x85   :  { %912 = vmatpush3.bf16.msra.mxu0 %v911_v60  ;;  %v965_v60 = vpack.c.bf16 %v483_v59, %v482_v58 }
  0x86   :  { %913 = vmatprep.subr.bf16.mxu0 %v1134_v0 }
  0x87   :  { %936 = vmatpush3.bf16.msra.mxu1 %v935_v22 }
  0x88   :  { %937 = vmatprep.subr.bf16.mxu1 %v1134_v0 }
  0x89   :  { %915 = vmatpush3.bf16.msra.mxu0 %v914_v63  ;;  %v968_v63 = vpack.c.bf16 %v485_v62, %v484_v61 }
  0x8a   :  { %916 = vmatprep.subr.bf16.mxu0 %v1134_v0 }
  0x8b   :  { %939 = vmatpush3.bf16.msra.mxu1 %v938_v25 }
  0x8c   :  { %940 = vmatprep.subr.bf16.mxu1 %v1134_v0 }
  0x8d   :  { %918 = vmatpush3.bf16.msra.mxu0 %v917_v4 }
  0x8e   :  { %919 = vmatprep.subr.bf16.mxu0 %v1134_v0 }
  0x8f   :  { %942 = vmatpush3.bf16.msra.mxu1 %v941_v28 }
  0x90   :  { %943 = vmatprep.subr.bf16.mxu1 %v1134_v0 }
  0x91   :  { %921 = vmatpush3.bf16.msra.mxu0 %v920_v7 }
  0x92   :  { %922 = vmatprep.subr.bf16.mxu0 %v1134_v0 }
  0x93   :  { %945 = vmatpush3.bf16.msra.mxu1 %v944_v31 }
  0x94   :  { %946 = vmatprep.subr.bf16.mxu1 %v1134_v0 }
  0x95   :  { %924 = vmatpush3.bf16.msra.mxu0 %v923_v10  ;;  %v971_v10 = vpack.c.bf16 %v487_v9, %v486_v8 }
  0x96   :  { %925 = vmatprep.subr.bf16.mxu0 %v1134_v0 }
  0x97   :  { %948 = vmatpush3.bf16.msra.mxu1 %v947_v43 }
  0x98   :  { %949 = vmatprep.subr.bf16.mxu1 %v1134_v0 }
  0x99   :  { %927 = vmatpush3.bf16.msra.mxu0 %v926_v13  ;;  %v974_v13 = vpack.c.bf16 %v489_v12, %v488_v11 }
  0x9a   :  { %952 = vmatprep.subr.bf16.mxu0 %v1134_v0 }
  0x9b   :  { %951 = vmatpush3.bf16.msra.mxu1 %v950_v46 }
 0x14f   :  { %v191_v32 = vpop.f32.mrb[0].mxu0 }
 0x150   :  { %v261_v33 = vpop.f32.mrb[0].mxu1  ;;  %v715_v35 = vpop.f32.mrb[1].mxu0 }
 0x151   :  { %v262_v36 = vadd.f32 %v261_v33, %v191_v32  ;;  %v750_v37 = vpop.f32.mrb[1].mxu1 }
 0x153   :  { %v272_v38 = vadd.f32 %v590_v34, %v262_v36 }
 0x155   :  { %v273_v39 = vmul.f32 0.2, %v272_v38 }
 0x157   :  { %v274_v40 = vmax.f32 %v272_v38, %v273_v39 }
 0x159   :  { %784 = vmatmul.mubr.f32.vlgmr.msra.gmra.mrb[2].mxu0 %v274_v40 }
 0x15a   :  { %853 = vmatprep.mubr.msk.f32.mxu0 %vm1135_vm0, %v1136_v1  ;;  %954 = vmatpush3.bf16.msra.mxu0 %v953_v50  ;;  %v478_v1 = vld [vmem:[#allocation11 + $0x120] sm:$0xff] }
 0x15b   :  { %955 = vmatprep.subr.bf16.mxu0 %v1134_v0  ;;  %v959_v54 = vpack.c.bf16 %v479_v53, %v478_v1 }
 0x15e   :  { %957 = vmatpush3.bf16.msra.mxu0 %v956_v52 }
 0x15f   :  { %958 = vmatprep.subr.bf16.mxu0 %v1134_v0 }
 0x162   :  { %960 = vmatpush3.bf16.msra.mxu0 %v959_v54 }
 0x163   :  { %961 = vmatprep.subr.bf16.mxu0 %v1134_v0 }
 0x166   :  { %963 = vmatpush3.bf16.msra.mxu0 %v962_v57 }
 0x167   :  { %964 = vmatprep.subr.bf16.mxu0 %v1134_v0 }
 0x16a   :  { %966 = vmatpush3.bf16.msra.mxu0 %v965_v60 }
 0x16b   :  { %967 = vmatprep.subr.bf16.mxu0 %v1134_v0 }
 0x16e   :  { %969 = vmatpush3.bf16.msra.mxu0 %v968_v63 }
 0x16f   :  { %970 = vmatprep.subr.bf16.mxu0 %v1134_v0 }
 0x172   :  { %972 = vmatpush3.bf16.msra.mxu0 %v971_v10 }
 0x173   :  { %973 = vmatprep.subr.bf16.mxu0 %v1134_v0 }
 0x176   :  { %975 = vmatpush3.bf16.msra.mxu0 %v974_v13 }
 0x22c   :  { %v366_v3 = vpop.f32.mrb[2].mxu0 }
 0x22d   :  { %v367_v4 = vadd.f32 %v591_v2, %v366_v3  ;;  %v785_v5 = vpop.f32.mrb[3].mxu0 }
 0x22f   :  { %v370_v6 = vmul.f32 0.2, %v367_v4 }
 0x231   :  { %v371_v7 = vmax.f32 %v367_v4, %v370_v6 }
 0x233   :  { %819 = vmatmul.mubr.f32.vlgmr.msra.gmra.mrb[2].mxu1 %v371_v7 }
 0x306   :  { %v465_v15 = vpop.f32.mrb[2].mxu1 }
 0x307   :  { %v466_v16 = vadd.f32 %v593_v14, %v465_v15  ;;  %v820_v17 = vpop.f32.mrb[3].mxu1 }
 0x309   :  { %v469_v18 = vmul.f32 0.2, %v466_v16 }
 0x30b   :  { %v470_v19 = vmax.f32 %v466_v16, %v469_v18 }
 0x30d   :  { %854 = vmatmul.mubr.f32.vlgmr.msra.gmra.mrb[4].mxu0 %v470_v19 }
 0x3e0   :  { %v564_v21 = vpop.f32.mrb[4].mxu0 }
 0x3e1   :  { %v565_v0 = vadd.f32 %v595_v20, %v564_v21  ;;  %v855_v22 = vpop.f32.mrb[5].mxu0 }
 0x3e3   :  { %v568_v23 = vmul.f32 0.2, %v565_v0 }
 0x3e5   :  { %v569_v24 = vmax.f32 %v565_v0, %v568_v23 }
 0x3e7   :  { %572 = vst [vmem:[#allocation12] sm:$0xff] %v569_v24 }
 0x3e8   :  { %1108 = shalt.err (!%p1105_p2)
}
 0x3e9   :  { %s1109_s6 = scalar_lea.hbm %s1328_s7, 128 }
 0x3ea   :  { %p1110_p3 = scmp.ne.s32.totalorder %s1328_s7, %s1109_s6  ;;  %p1113_p4 = scmp.lt.u32.totalorder %s1109_s6, %s1328_s7 }
 0x3ec   :  { %p1115_p5 = pnand %p1113_p4, %p1110_p3 }
 0x3ee   :  { %1118 = shalt.err (!%p1115_p5)
}
 0x3ef   :  { %582 = dma.vmem_to_hbm [thread:$0]  %s580_s19, 128, %s1328_s7, [#allocation5]  }
 0x3f0   :  { %1125 = dma.done.wait [#allocation5], 128  }
 0x3f1   :  { %1126 = vsyncadd [#allocation5], 4294967168 }
 0x3f2   :  { %586 = vsyncpa [#allocation4], 1 }
 0x3f3   :  { %587 = vsyncpa [#allocation7], 1 }
 0x3f4   :  { %588 = vsyncpa [#allocation10], 1 }
 0x3f5   :  { %589 = vsyncpa [#allocation5], 1 }

</bundles_post_ra>
